<compile_context>
chip_gen: v6e
topology: v6e:2x2x1
jax: 0.10.0
libtpu: 0.0.40
codegen_flags: <defaults>
</compile_context>

<pallas_src>
import math
import jax
import jax.numpy as jnp
from jax.experimental import pallas as pl
from jax.experimental.pallas import tpu as pltpu


def _self_attention_kernel(num_heads, head_dim):
    """Returns a kernel closure over the static head configuration."""
    inv_sqrt_hd = 1.0 / math.sqrt(head_dim)

    def kernel(x_ref, wq_ref, bq_ref, wk_ref, bk_ref, wv_ref, bv_ref,
               wd_ref, bd_ref, o_ref):
        B, S, D_in = x_ref.shape
        H = wq_ref.shape[1]

        # Flatten batch*seq for one big MXU projection per weight (layout-trivial reshape:
        # last dim unchanged, S=8 sublane-aligned).
        x2 = x_ref[...].reshape(B * S, D_in)

        q = (jnp.dot(x2, wq_ref[...], preferred_element_type=jnp.float32)
             + bq_ref[...]).reshape(B, S, H)
        k = (jnp.dot(x2, wk_ref[...], preferred_element_type=jnp.float32)
             + bk_ref[...]).reshape(B, S, H)
        v = (jnp.dot(x2, wv_ref[...], preferred_element_type=jnp.float32)
             + bv_ref[...]).reshape(B, S, H)

        wd = wd_ref[...]            # (1, H) — lane-oriented row of the H->1 dense weight.

        # Per-head attention, batched over B (static Python loop; num_heads small & static).
        hidden = jnp.zeros((B, S), jnp.float32)
        for h in range(num_heads):
            sl = slice(h * head_dim, (h + 1) * head_dim)
            qh = q[:, :, sl]        # (B, S, hd)
            kh = k[:, :, sl]        # (B, S, hd)
            vh = v[:, :, sl]        # (B, S, hd)

            # Contract on the last dims directly (no explicit kh.T).
            scores = jnp.einsum("bqd,bkd->bqk", qh, kh,
                                preferred_element_type=jnp.float32) * inv_sqrt_hd
            scores = scores - jnp.max(scores, axis=-1, keepdims=True)
            p = jnp.exp(scores)
            probs = p * pl.reciprocal(jnp.sum(p, axis=-1, keepdims=True), approx=True)

            ctx_h = jnp.einsum("bqk,bkd->bqd", probs, vh,
                               preferred_element_type=jnp.float32)   # (B, S, hd)

            # Final H->1 dense projection as a per-head VPU multiply-reduce
            # (equivalent to concat(heads) @ wd, without the concat or a Nx1 MXU matmul).
            hidden = hidden + jnp.sum(ctx_h * wd[:, sl], axis=-1)    # (B, S)

        o_ref[...] = (hidden + bd_ref[...]).astype(o_ref.dtype)      # (B, S), lane-dense

    return kernel


def self_attention_pallas(x, params, num_heads):
    """x: (B, S, D_in) float32. params: dict of weights. Returns (B, S, 1)."""
    B, S, D_in = x.shape
    H = params["wq"].shape[1]
    head_dim = H // num_heads

    wd_row = params["wd"].reshape(1, H)    # (H, 1) -> (1, H): lane-oriented for VPU reduce

    out2d = pl.pallas_call(
        _self_attention_kernel(num_heads, head_dim),
        out_shape=jax.ShapeDtypeStruct((B, S), x.dtype),
    )(x,
      params["wq"], params["bq"],
      params["wk"], params["bk"],
      params["wv"], params["bv"],
      wd_row, params["bd"])

    return out2d.reshape(B, S, 1)


def init_params(key, input_size, hidden_size):
    """Deterministic init mimicking nn.Linear default (uniform(-1/sqrt(fan_in), +))."""
    ks = jax.random.split(key, 8)

    def linear(kw, kb, fan_in, fan_out):
        bound = 1.0 / math.sqrt(fan_in)
        w = jax.random.uniform(kw, (fan_in, fan_out), jnp.float32, -bound, bound)
        b = jax.random.uniform(kb, (1, fan_out), jnp.float32, -bound, bound)
        return w, b

    wq, bq = linear(ks[0], ks[1], input_size, hidden_size)
    wk, bk = linear(ks[2], ks[3], input_size, hidden_size)
    wv, bv = linear(ks[4], ks[5], input_size, hidden_size)
    wd, bd = linear(ks[6], ks[7], hidden_size, 1)
    return dict(wq=wq, bq=bq, wk=wk, bk=bk, wv=wv, bv=bv, wd=wd, bd=bd)


def self_attention_ref(x, params, num_heads):
    """Pure-JAX reference mirroring the PyTorch forward (dropout = identity)."""
    B, S, D_in = x.shape
    H = params["wq"].shape[1]
    hd = H // num_heads

    q = x @ params["wq"] + params["bq"]
    k = x @ params["wk"] + params["bk"]
    v = x @ params["wv"] + params["bv"]

    def split_heads(t):  # (B,S,H) -> (B,nh,S,hd)
        return t.reshape(B, S, num_heads, hd).transpose(0, 2, 1, 3)

    q, k, v = split_heads(q), split_heads(k), split_heads(v)
    scores = jnp.einsum("bhqd,bhkd->bhqk", q, k) / math.sqrt(hd)
    probs = jax.nn.softmax(scores, axis=-1)
    ctx = jnp.einsum("bhqk,bhkd->bhqd", probs, v)
    ctx = ctx.transpose(0, 2, 1, 3).reshape(B, S, H)
    return ctx @ params["wd"] + params["bd"]


if __name__ == "__main__":
    num_heads = 4
    input_size = 32
    hidden_size = 32
    B, S = 2, 8

    key = jax.random.PRNGKey(0)
    k_x, k_p = jax.random.split(key)
    x = jax.random.normal(k_x, (B, S, input_size), jnp.float32)
    params = init_params(k_p, input_size, hidden_size)

    out = self_attention_pallas(x, params, num_heads)
    out = jax.block_until_ready(out)

    ref = self_attention_ref(x, params, num_heads)
    assert out.shape == (B, S, 1), out.shape
    # Tolerance covers the EUP approx-reciprocal in the softmax denominator.
    assert jnp.allclose(out, ref, atol=1e-3, rtol=1e-3), float(jnp.max(jnp.abs(out - ref)))

    print("KERNEL_OK")
</pallas_src>

<mosaic_0001>
module attributes {stable_mosaic.version = 11 : i64} {
  func.func @kernel(%arg0: memref<2x8x32xf32, #tpu.memory_space<vmem>>, %arg1: memref<32x32xf32, #tpu.memory_space<vmem>>, %arg2: memref<1x32xf32, #tpu.memory_space<vmem>>, %arg3: memref<32x32xf32, #tpu.memory_space<vmem>>, %arg4: memref<1x32xf32, #tpu.memory_space<vmem>>, %arg5: memref<32x32xf32, #tpu.memory_space<vmem>>, %arg6: memref<1x32xf32, #tpu.memory_space<vmem>>, %arg7: memref<1x32xf32, #tpu.memory_space<vmem>>, %arg8: memref<1x1xf32, #tpu.memory_space<vmem>>, %arg9: memref<2x8xf32, #tpu.memory_space<vmem>>) attributes {dimension_semantics = [], scalar_prefetch = 0 : i64, scratch_operands = 0 : i64, tpu.core_type = #tpu.core_type<tc>} {
    %c0 = arith.constant 0 : index
    %c0_0 = arith.constant 0 : index
    %c0_1 = arith.constant 0 : index
    %0 = vector.load %arg0[%c0, %c0_0, %c0_1] : memref<2x8x32xf32, #tpu.memory_space<vmem>>, vector<2x8x32xf32>
    %1 = vector.shape_cast %0 : vector<2x8x32xf32> to vector<16x32xf32>
    %c0_2 = arith.constant 0 : index
    %c0_3 = arith.constant 0 : index
    %2 = vector.load %arg1[%c0_2, %c0_3] : memref<32x32xf32, #tpu.memory_space<vmem>>, vector<32x32xf32>
    %cst = arith.constant dense<0.000000e+00> : vector<16x32xf32>
    %3 = tpu.matmul %1, %2, %cst {dimension_numbers = #tpu.dot_dimension_numbers<[1], [0], [0], [1], [0, 0, 1, 1], [], []>} : vector<16x32xf32>, vector<32x32xf32>, vector<16x32xf32> -> vector<16x32xf32>
    %c0_4 = arith.constant 0 : index
    %c0_5 = arith.constant 0 : index
    %4 = vector.load %arg2[%c0_4, %c0_5] : memref<1x32xf32, #tpu.memory_space<vmem>>, vector<1x32xf32>
    %5 = vector.broadcast %4 : vector<1x32xf32> to vector<16x32xf32>
    %6 = arith.addf %3, %5 : vector<16x32xf32>
    %7 = vector.shape_cast %6 : vector<16x32xf32> to vector<2x8x32xf32>
    %c0_6 = arith.constant 0 : index
    %c0_7 = arith.constant 0 : index
    %8 = vector.load %arg3[%c0_6, %c0_7] : memref<32x32xf32, #tpu.memory_space<vmem>>, vector<32x32xf32>
    %cst_8 = arith.constant dense<0.000000e+00> : vector<16x32xf32>
    %9 = tpu.matmul %1, %8, %cst_8 {dimension_numbers = #tpu.dot_dimension_numbers<[1], [0], [0], [1], [0, 0, 1, 1], [], []>} : vector<16x32xf32>, vector<32x32xf32>, vector<16x32xf32> -> vector<16x32xf32>
    %c0_9 = arith.constant 0 : index
    %c0_10 = arith.constant 0 : index
    %10 = vector.load %arg4[%c0_9, %c0_10] : memref<1x32xf32, #tpu.memory_space<vmem>>, vector<1x32xf32>
    %11 = vector.broadcast %10 : vector<1x32xf32> to vector<16x32xf32>
    %12 = arith.addf %9, %11 : vector<16x32xf32>
    %13 = vector.shape_cast %12 : vector<16x32xf32> to vector<2x8x32xf32>
    %c0_11 = arith.constant 0 : index
    %c0_12 = arith.constant 0 : index
    %14 = vector.load %arg5[%c0_11, %c0_12] : memref<32x32xf32, #tpu.memory_space<vmem>>, vector<32x32xf32>
    %cst_13 = arith.constant dense<0.000000e+00> : vector<16x32xf32>
    %15 = tpu.matmul %1, %14, %cst_13 {dimension_numbers = #tpu.dot_dimension_numbers<[1], [0], [0], [1], [0, 0, 1, 1], [], []>} : vector<16x32xf32>, vector<32x32xf32>, vector<16x32xf32> -> vector<16x32xf32>
    %c0_14 = arith.constant 0 : index
    %c0_15 = arith.constant 0 : index
    %16 = vector.load %arg6[%c0_14, %c0_15] : memref<1x32xf32, #tpu.memory_space<vmem>>, vector<1x32xf32>
    %17 = vector.broadcast %16 : vector<1x32xf32> to vector<16x32xf32>
    %18 = arith.addf %15, %17 : vector<16x32xf32>
    %19 = vector.shape_cast %18 : vector<16x32xf32> to vector<2x8x32xf32>
    %c0_16 = arith.constant 0 : index
    %c0_17 = arith.constant 0 : index
    %20 = vector.load %arg7[%c0_16, %c0_17] : memref<1x32xf32, #tpu.memory_space<vmem>>, vector<1x32xf32>
    %cst_18 = arith.constant 0.000000e+00 : f32
    %21 = vector.broadcast %cst_18 : f32 to vector<2x8xf32>
    %22 = vector.extract_strided_slice %7 {offsets = [0, 0, 0], sizes = [2, 8, 8], strides = [1, 1, 1]} : vector<2x8x32xf32> to vector<2x8x8xf32>
    %23 = vector.extract_strided_slice %13 {offsets = [0, 0, 0], sizes = [2, 8, 8], strides = [1, 1, 1]} : vector<2x8x32xf32> to vector<2x8x8xf32>
    %24 = vector.extract_strided_slice %19 {offsets = [0, 0, 0], sizes = [2, 8, 8], strides = [1, 1, 1]} : vector<2x8x32xf32> to vector<2x8x8xf32>
    "tpu.trace_start"() <{level = 10 : i32, message = "bqd,bkd->bqk"}> : () -> ()
    %cst_19 = arith.constant dense<0.000000e+00> : vector<2x8x8xf32>
    %25 = tpu.matmul %22, %23, %cst_19 {dimension_numbers = #tpu.dot_dimension_numbers<[2], [2], [1], [1], [0, 0, 0, 1, 1, 1], [0], [0]>} : vector<2x8x8xf32>, vector<2x8x8xf32>, vector<2x8x8xf32> -> vector<2x8x8xf32>
    "tpu.trace_stop"() : () -> ()
    %cst_20 = arith.constant 0.353553385 : f32
    %26 = vector.broadcast %cst_20 : f32 to vector<2x8x8xf32>
    %27 = arith.mulf %25, %26 : vector<2x8x8xf32>
    %cst_21 = arith.constant dense<0xFF800000> : vector<2x8xf32>
    %28 = vector.multi_reduction <maximumf>, %27, %cst_21 [2] : vector<2x8x8xf32> to vector<2x8xf32>
    %29 = vector.shape_cast %28 : vector<2x8xf32> to vector<2x8x1xf32>
    %30 = vector.broadcast %29 : vector<2x8x1xf32> to vector<2x8x8xf32>
    %31 = arith.subf %27, %30 : vector<2x8x8xf32>
    %32 = math.exp %31 : vector<2x8x8xf32>
    %cst_22 = arith.constant dense<0.000000e+00> : vector<2x8xf32>
    %33 = vector.multi_reduction <add>, %32, %cst_22 [2] : vector<2x8x8xf32> to vector<2x8xf32>
    %34 = vector.shape_cast %33 : vector<2x8xf32> to vector<2x8x1xf32>
    %35 = tpu.reciprocal %34 {approx = true} : vector<2x8x1xf32> -> vector<2x8x1xf32>
    %36 = vector.broadcast %35 : vector<2x8x1xf32> to vector<2x8x8xf32>
    %37 = arith.mulf %32, %36 : vector<2x8x8xf32>
    "tpu.trace_start"() <{level = 10 : i32, message = "bqk,bkd->bqd"}> : () -> ()
    %cst_23 = arith.constant dense<0.000000e+00> : vector<2x8x8xf32>
    %38 = tpu.matmul %37, %24, %cst_23 {dimension_numbers = #tpu.dot_dimension_numbers<[2], [1], [1], [2], [0, 0, 0, 1, 1, 2], [0], [0]>} : vector<2x8x8xf32>, vector<2x8x8xf32>, vector<2x8x8xf32> -> vector<2x8x8xf32>
    "tpu.trace_stop"() : () -> ()
    %39 = vector.extract_strided_slice %20 {offsets = [0, 0], sizes = [1, 8], strides = [1, 1]} : vector<1x32xf32> to vector<1x8xf32>
    %40 = vector.shape_cast %39 : vector<1x8xf32> to vector<1x1x8xf32>
    %41 = vector.broadcast %40 : vector<1x1x8xf32> to vector<2x8x8xf32>
    %42 = arith.mulf %38, %41 : vector<2x8x8xf32>
    %cst_24 = arith.constant dense<0.000000e+00> : vector<2x8xf32>
    %43 = vector.multi_reduction <add>, %42, %cst_24 [2] : vector<2x8x8xf32> to vector<2x8xf32>
    %44 = arith.addf %21, %43 : vector<2x8xf32>
    %45 = vector.extract_strided_slice %7 {offsets = [0, 0, 8], sizes = [2, 8, 8], strides = [1, 1, 1]} : vector<2x8x32xf32> to vector<2x8x8xf32>
    %46 = vector.extract_strided_slice %13 {offsets = [0, 0, 8], sizes = [2, 8, 8], strides = [1, 1, 1]} : vector<2x8x32xf32> to vector<2x8x8xf32>
    %47 = vector.extract_strided_slice %19 {offsets = [0, 0, 8], sizes = [2, 8, 8], strides = [1, 1, 1]} : vector<2x8x32xf32> to vector<2x8x8xf32>
    "tpu.trace_start"() <{level = 10 : i32, message = "bqd,bkd->bqk"}> : () -> ()
    %cst_25 = arith.constant dense<0.000000e+00> : vector<2x8x8xf32>
    %48 = tpu.matmul %45, %46, %cst_25 {dimension_numbers = #tpu.dot_dimension_numbers<[2], [2], [1], [1], [0, 0, 0, 1, 1, 1], [0], [0]>} : vector<2x8x8xf32>, vector<2x8x8xf32>, vector<2x8x8xf32> -> vector<2x8x8xf32>
    "tpu.trace_stop"() : () -> ()
    %cst_26 = arith.constant 0.353553385 : f32
    %49 = vector.broadcast %cst_26 : f32 to vector<2x8x8xf32>
    %50 = arith.mulf %48, %49 : vector<2x8x8xf32>
    %cst_27 = arith.constant dense<0xFF800000> : vector<2x8xf32>
    %51 = vector.multi_reduction <maximumf>, %50, %cst_27 [2] : vector<2x8x8xf32> to vector<2x8xf32>
    %52 = vector.shape_cast %51 : vector<2x8xf32> to vector<2x8x1xf32>
    %53 = vector.broadcast %52 : vector<2x8x1xf32> to vector<2x8x8xf32>
    %54 = arith.subf %50, %53 : vector<2x8x8xf32>
    %55 = math.exp %54 : vector<2x8x8xf32>
    %cst_28 = arith.constant dense<0.000000e+00> : vector<2x8xf32>
    %56 = vector.multi_reduction <add>, %55, %cst_28 [2] : vector<2x8x8xf32> to vector<2x8xf32>
    %57 = vector.shape_cast %56 : vector<2x8xf32> to vector<2x8x1xf32>
    %58 = tpu.reciprocal %57 {approx = true} : vector<2x8x1xf32> -> vector<2x8x1xf32>
    %59 = vector.broadcast %58 : vector<2x8x1xf32> to vector<2x8x8xf32>
    %60 = arith.mulf %55, %59 : vector<2x8x8xf32>
    "tpu.trace_start"() <{level = 10 : i32, message = "bqk,bkd->bqd"}> : () -> ()
    %cst_29 = arith.constant dense<0.000000e+00> : vector<2x8x8xf32>
    %61 = tpu.matmul %60, %47, %cst_29 {dimension_numbers = #tpu.dot_dimension_numbers<[2], [1], [1], [2], [0, 0, 0, 1, 1, 2], [0], [0]>} : vector<2x8x8xf32>, vector<2x8x8xf32>, vector<2x8x8xf32> -> vector<2x8x8xf32>
    "tpu.trace_stop"() : () -> ()
    %62 = vector.extract_strided_slice %20 {offsets = [0, 8], sizes = [1, 8], strides = [1, 1]} : vector<1x32xf32> to vector<1x8xf32>
    %63 = vector.shape_cast %62 : vector<1x8xf32> to vector<1x1x8xf32>
    %64 = vector.broadcast %63 : vector<1x1x8xf32> to vector<2x8x8xf32>
    %65 = arith.mulf %61, %64 : vector<2x8x8xf32>
    %cst_30 = arith.constant dense<0.000000e+00> : vector<2x8xf32>
    %66 = vector.multi_reduction <add>, %65, %cst_30 [2] : vector<2x8x8xf32> to vector<2x8xf32>
    %67 = arith.addf %44, %66 : vector<2x8xf32>
    %68 = vector.extract_strided_slice %7 {offsets = [0, 0, 16], sizes = [2, 8, 8], strides = [1, 1, 1]} : vector<2x8x32xf32> to vector<2x8x8xf32>
    %69 = vector.extract_strided_slice %13 {offsets = [0, 0, 16], sizes = [2, 8, 8], strides = [1, 1, 1]} : vector<2x8x32xf32> to vector<2x8x8xf32>
    %70 = vector.extract_strided_slice %19 {offsets = [0, 0, 16], sizes = [2, 8, 8], strides = [1, 1, 1]} : vector<2x8x32xf32> to vector<2x8x8xf32>
    "tpu.trace_start"() <{level = 10 : i32, message = "bqd,bkd->bqk"}> : () -> ()
    %cst_31 = arith.constant dense<0.000000e+00> : vector<2x8x8xf32>
    %71 = tpu.matmul %68, %69, %cst_31 {dimension_numbers = #tpu.dot_dimension_numbers<[2], [2], [1], [1], [0, 0, 0, 1, 1, 1], [0], [0]>} : vector<2x8x8xf32>, vector<2x8x8xf32>, vector<2x8x8xf32> -> vector<2x8x8xf32>
    "tpu.trace_stop"() : () -> ()
    %cst_32 = arith.constant 0.353553385 : f32
    %72 = vector.broadcast %cst_32 : f32 to vector<2x8x8xf32>
    %73 = arith.mulf %71, %72 : vector<2x8x8xf32>
    %cst_33 = arith.constant dense<0xFF800000> : vector<2x8xf32>
    %74 = vector.multi_reduction <maximumf>, %73, %cst_33 [2] : vector<2x8x8xf32> to vector<2x8xf32>
    %75 = vector.shape_cast %74 : vector<2x8xf32> to vector<2x8x1xf32>
    %76 = vector.broadcast %75 : vector<2x8x1xf32> to vector<2x8x8xf32>
    %77 = arith.subf %73, %76 : vector<2x8x8xf32>
    %78 = math.exp %77 : vector<2x8x8xf32>
    %cst_34 = arith.constant dense<0.000000e+00> : vector<2x8xf32>
    %79 = vector.multi_reduction <add>, %78, %cst_34 [2] : vector<2x8x8xf32> to vector<2x8xf32>
    %80 = vector.shape_cast %79 : vector<2x8xf32> to vector<2x8x1xf32>
    %81 = tpu.reciprocal %80 {approx = true} : vector<2x8x1xf32> -> vector<2x8x1xf32>
    %82 = vector.broadcast %81 : vector<2x8x1xf32> to vector<2x8x8xf32>
    %83 = arith.mulf %78, %82 : vector<2x8x8xf32>
    "tpu.trace_start"() <{level = 10 : i32, message = "bqk,bkd->bqd"}> : () -> ()
    %cst_35 = arith.constant dense<0.000000e+00> : vector<2x8x8xf32>
    %84 = tpu.matmul %83, %70, %cst_35 {dimension_numbers = #tpu.dot_dimension_numbers<[2], [1], [1], [2], [0, 0, 0, 1, 1, 2], [0], [0]>} : vector<2x8x8xf32>, vector<2x8x8xf32>, vector<2x8x8xf32> -> vector<2x8x8xf32>
    "tpu.trace_stop"() : () -> ()
    %85 = vector.extract_strided_slice %20 {offsets = [0, 16], sizes = [1, 8], strides = [1, 1]} : vector<1x32xf32> to vector<1x8xf32>
    %86 = vector.shape_cast %85 : vector<1x8xf32> to vector<1x1x8xf32>
    %87 = vector.broadcast %86 : vector<1x1x8xf32> to vector<2x8x8xf32>
    %88 = arith.mulf %84, %87 : vector<2x8x8xf32>
    %cst_36 = arith.constant dense<0.000000e+00> : vector<2x8xf32>
    %89 = vector.multi_reduction <add>, %88, %cst_36 [2] : vector<2x8x8xf32> to vector<2x8xf32>
    %90 = arith.addf %67, %89 : vector<2x8xf32>
    %91 = vector.extract_strided_slice %7 {offsets = [0, 0, 24], sizes = [2, 8, 8], strides = [1, 1, 1]} : vector<2x8x32xf32> to vector<2x8x8xf32>
    %92 = vector.extract_strided_slice %13 {offsets = [0, 0, 24], sizes = [2, 8, 8], strides = [1, 1, 1]} : vector<2x8x32xf32> to vector<2x8x8xf32>
    %93 = vector.extract_strided_slice %19 {offsets = [0, 0, 24], sizes = [2, 8, 8], strides = [1, 1, 1]} : vector<2x8x32xf32> to vector<2x8x8xf32>
    "tpu.trace_start"() <{level = 10 : i32, message = "bqd,bkd->bqk"}> : () -> ()
    %cst_37 = arith.constant dense<0.000000e+00> : vector<2x8x8xf32>
    %94 = tpu.matmul %91, %92, %cst_37 {dimension_numbers = #tpu.dot_dimension_numbers<[2], [2], [1], [1], [0, 0, 0, 1, 1, 1], [0], [0]>} : vector<2x8x8xf32>, vector<2x8x8xf32>, vector<2x8x8xf32> -> vector<2x8x8xf32>
    "tpu.trace_stop"() : () -> ()
    %cst_38 = arith.constant 0.353553385 : f32
    %95 = vector.broadcast %cst_38 : f32 to vector<2x8x8xf32>
    %96 = arith.mulf %94, %95 : vector<2x8x8xf32>
    %cst_39 = arith.constant dense<0xFF800000> : vector<2x8xf32>
    %97 = vector.multi_reduction <maximumf>, %96, %cst_39 [2] : vector<2x8x8xf32> to vector<2x8xf32>
    %98 = vector.shape_cast %97 : vector<2x8xf32> to vector<2x8x1xf32>
    %99 = vector.broadcast %98 : vector<2x8x1xf32> to vector<2x8x8xf32>
    %100 = arith.subf %96, %99 : vector<2x8x8xf32>
    %101 = math.exp %100 : vector<2x8x8xf32>
    %cst_40 = arith.constant dense<0.000000e+00> : vector<2x8xf32>
    %102 = vector.multi_reduction <add>, %101, %cst_40 [2] : vector<2x8x8xf32> to vector<2x8xf32>
    %103 = vector.shape_cast %102 : vector<2x8xf32> to vector<2x8x1xf32>
    %104 = tpu.reciprocal %103 {approx = true} : vector<2x8x1xf32> -> vector<2x8x1xf32>
    %105 = vector.broadcast %104 : vector<2x8x1xf32> to vector<2x8x8xf32>
    %106 = arith.mulf %101, %105 : vector<2x8x8xf32>
    "tpu.trace_start"() <{level = 10 : i32, message = "bqk,bkd->bqd"}> : () -> ()
    %cst_41 = arith.constant dense<0.000000e+00> : vector<2x8x8xf32>
    %107 = tpu.matmul %106, %93, %cst_41 {dimension_numbers = #tpu.dot_dimension_numbers<[2], [1], [1], [2], [0, 0, 0, 1, 1, 2], [0], [0]>} : vector<2x8x8xf32>, vector<2x8x8xf32>, vector<2x8x8xf32> -> vector<2x8x8xf32>
    "tpu.trace_stop"() : () -> ()
    %108 = vector.extract_strided_slice %20 {offsets = [0, 24], sizes = [1, 8], strides = [1, 1]} : vector<1x32xf32> to vector<1x8xf32>
    %109 = vector.shape_cast %108 : vector<1x8xf32> to vector<1x1x8xf32>
    %110 = vector.broadcast %109 : vector<1x1x8xf32> to vector<2x8x8xf32>
    %111 = arith.mulf %107, %110 : vector<2x8x8xf32>
    %cst_42 = arith.constant dense<0.000000e+00> : vector<2x8xf32>
    %112 = vector.multi_reduction <add>, %111, %cst_42 [2] : vector<2x8x8xf32> to vector<2x8xf32>
    %113 = arith.addf %90, %112 : vector<2x8xf32>
    %c0_43 = arith.constant 0 : index
    %c0_44 = arith.constant 0 : index
    %114 = vector.load %arg8[%c0_43, %c0_44] : memref<1x1xf32, #tpu.memory_space<vmem>>, vector<1x1xf32>
    %115 = vector.broadcast %114 : vector<1x1xf32> to vector<2x8xf32>
    %116 = arith.addf %113, %115 : vector<2x8xf32>
    %c0_45 = arith.constant 0 : index
    %c0_46 = arith.constant 0 : index
    %117 = vector.load %arg9[%c0_45, %c0_46] : memref<2x8xf32, #tpu.memory_space<vmem>>, vector<2x8xf32>
    tpu.vector_store %arg9[%c0_45, %c0_46], %116 {strides = array<i32>} : memref<2x8xf32, #tpu.memory_space<vmem>>, vector<2x8xf32>,
    return
  }
}

</mosaic_0001>

<bundles_post_ra>
// kernel: tpu_custom_call.1
= control target key start
LH: loop header
LB: loop body
LE: loop exit
PB: predicated region body
PF: predicated region fallthrough
CT: control target
= control target key end

     0   :  { %s2409_s0 = inlined_call_operand.hbm [shape: f32[2,8,32], index: 0, kind: input, shape index: {}]   ;;  %s2410_s1 = inlined_call_operand.hbm [shape: f32[32,32], index: 1, kind: input, shape index: {}]   ;;  %s2411_s2 = inlined_call_operand.vmem [shape: f32[1,32], index: 2, kind: input, shape index: {}]   ;;  %s2412_s3 = inlined_call_operand.hbm [shape: f32[32,32], index: 3, kind: input, shape index: {}]   ;;  %s2413_s4 = inlined_call_operand.vmem [shape: f32[1,32], index: 4, kind: input, shape index: {}]   ;;  %s2414_s5 = inlined_call_operand.hbm [shape: f32[32,32], index: 5, kind: input, shape index: {}]   ;;  %s2415_s6 = inlined_call_operand.vmem [shape: f32[1,32], index: 6, kind: input, shape index: {}]   ;;  %s2416_s7 = inlined_call_operand.vmem [shape: f32[1,32], index: 7, kind: input, shape index: {}]   ;;  %s2417_s8 = inlined_call_operand.<no memory space> [shape: f32[1,1], index: 8, kind: input, shape index: {}]   ;;  %s2418_s9 = inlined_call_operand.hbm [shape: f32[2,8], index: 9, kind: output, shape index: {}]  }
   0x1   :  { %v14_v0 = vstv %s2417_s8 }
   0x2   :  { %15 = vst [vmem:[#allocation2] sm:$0x1] %v14_v0 }
   0x3   :  { %16 = vsyncpa [#allocation4], 0 }
   0x4   :  { %17 = vsyncpa [#allocation7], 0 }
   0x5   :  { %18 = vsyncpa [#allocation10], 0 }
   0x6   :  { %19 = vsyncpa [#allocation5], 0  ;;  %s2133_s11 = smov [#allocation6]   ;;  %s2134_s13 = smov [#allocation3]  }
   0x7   :  { %s37_s12 = sshll.u32 %s2133_s11, 4  ;;  %s25_s14 = sshll.u32 %s2134_s13, 4  ;;  %s38_s12 = int_to_ptr.vmem [resolvable:$true] %s37_s12  ;;  %s26_s14 = int_to_ptr.vmem [resolvable:$true] %s25_s14 }
   0x8   :  { %s2033_s15 = scalar_lea.vmem %s38_s12, 512  ;;  %p2038_p1 = scmp.lt.s32.totalorder %s38_s12, %s38_s12 }
   0x9   :  { %p2034_p0 = scmp.ne.s32.totalorder %s38_s12, %s2033_s15  ;;  %p2039_p2 = scmp.lt.s32.totalorder %s2033_s15, %s2033_s15 }
   0xb   :  { %p2040_p3 = por %p2039_p2, %p2038_p1 }
   0xd   :  { %p2041_p4 = pnand %p2040_p3, %p2034_p0 }
   0xf   :  { %2044 = shalt.err (!%p2041_p4)
}
  0x10   :  { %s2135_s16 = smov 128   ;;  %s2136_s8 = smov 8  }
  0x11   :  { %43 = dma.hbm_to_vmem [thread:$0]  %s2410_s1, 512, %s38_s12, [#allocation7], %s2135_s16, %s2135_s16, %s2136_s8  }
  0x12   :  { %s2053_s19 = scalar_lea.vmem %s26_s14, 256  ;;  %p2058_p6 = scmp.lt.s32.totalorder %s26_s14, %s26_s14 }
  0x13   :  { %p2054_p5 = scmp.ne.s32.totalorder %s26_s14, %s2053_s19  ;;  %p2059_p7 = scmp.lt.s32.totalorder %s2053_s19, %s2053_s19 }
  0x15   :  { %p2060_p8 = por %p2059_p7, %p2058_p6 }
  0x17   :  { %p2061_p9 = pnand %p2060_p8, %p2054_p5 }
  0x19   :  { %2064 = shalt.err (!%p2061_p9)
}
  0x1a   :  { %31 = dma.hbm_to_vmem [thread:$0]  %s2409_s0, 256, %s26_s14, [#allocation4], %s2135_s16, %s2135_s16, %s2136_s8  }
  0x1b   :  { %s2137_s22 = smov [#allocation8]   ;;  %s2138_s24 = smov [#allocation9]  }
  0x1c   :  { %s51_s23 = sshll.u32 %s2137_s22, 4  ;;  %s65_s25 = sshll.u32 %s2138_s24, 4  ;;  %s52_s23 = int_to_ptr.vmem [resolvable:$true] %s51_s23  ;;  %s66_s25 = int_to_ptr.vmem [resolvable:$true] %s65_s25 }
  0x1d   :  { %s2073_s1 = scalar_lea.vmem %s52_s23, 512  ;;  %p2078_p11 = scmp.lt.s32.totalorder %s52_s23, %s52_s23 }
  0x1e   :  { %p2074_p10 = scmp.ne.s32.totalorder %s52_s23, %s2073_s1  ;;  %p2079_p12 = scmp.lt.s32.totalorder %s2073_s1, %s2073_s1 }
  0x20   :  { %p2080_p13 = por %p2079_p12, %p2078_p11 }
  0x22   :  { %p2081_p0 = pnand %p2080_p13, %p2074_p10 }
  0x24   :  { %2084 = shalt.err (!%p2081_p0)
}
  0x25   :  { %57 = dma.hbm_to_vmem [thread:$0]  %s2412_s3, 512, %s52_s23, [#allocation7], %s2135_s16, %s2135_s16, %s2136_s8  }
  0x26   :  { %s2093_s0 = scalar_lea.vmem %s66_s25, 512  ;;  %p2098_p2 = scmp.lt.s32.totalorder %s66_s25, %s66_s25 }
  0x27   :  { %p2094_p1 = scmp.ne.s32.totalorder %s66_s25, %s2093_s0  ;;  %p2099_p3 = scmp.lt.s32.totalorder %s2093_s0, %s2093_s0 }
  0x29   :  { %p2100_p4 = por %p2099_p3, %p2098_p2 }
  0x2b   :  { %p2101_p5 = pnand %p2100_p4, %p2094_p1 }
  0x2d   :  { %2104 = shalt.err (!%p2101_p5)
}
  0x2e   :  { %71 = dma.hbm_to_vmem [thread:$0]  %s2414_s5, 512, %s66_s25, [#allocation10], %s2135_s16, %s2135_s16, %s2136_s8  }
  0x2f   :  { %2125 = dma.done.wait [#allocation4], 256  }
  0x30   :  { %2126 = vsyncadd [#allocation4], 4294967040 }
  0x31   :  { %2127 = dma.done.wait [#allocation7], 1024  }
  0x32   :  { %2128 = vsyncadd [#allocation7], 4294966272 }
  0x33   :  { %2129 = dma.done.wait [#allocation10], 512  }
  0x34   :  { %2130 = vsyncadd [#allocation10], 4294966784  ;;  %v188_v1 = vld [vmem:[#allocation8 + $0x18] sm:$0xff]  ;;  %v187_v3 = vld [vmem:[#allocation8 + $0x10] sm:$0xff]  ;;  %vm103_vm0 = vcmask 261120   ;;  %v2139_v11 = vmov 0.0  }
  0x35   :  { %v95_v2 = vld [vmem:[#allocation6 + $0x18] sm:$0xff]  ;;  %1876 = vmatprep.subr.mxu1 %v188_v1  ;;  %v94_v4 = vld [vmem:[#allocation6 + $0x10] sm:$0xff]  ;;  %v186_v5 = vld [vmem:[#allocation8 + $0x8] sm:$0xff]  ;;  %vm2140_vm1 = vmmov 0   ;;  %vm358_vm2 = vcmask 64512   ;;  %s2141_s11 = smov 120  }
  0x36   :  { %1865 = vmatprep.subr.mxu0 %v95_v2  ;;  %1877 = vmatpush3.msra.mxu1 %v188_v1  ;;  %v93_v6 = vld [vmem:[#allocation6 + $0x8] sm:$0xff]  ;;  %v185_v7 = vld [vmem:[#allocation8] sm:$0xff]  ;;  %v90_v8 = vld [vmem:[#allocation3] sm:$0xff]  ;;  %s2143_s12 = smov 104   ;;  %vm1758_vm3 = vcmask 1041409   ;;  %vm1761_vm4 = vcmask 58368  }
  0x37   :  { %1866 = vmatpush3.msra.mxu0 %v95_v2  ;;  %1878 = vmatprep.subr.mxu1 %v187_v3  ;;  %v92_v9 = vld [vmem:[#allocation6] sm:$0xff]  ;;  %v91_v10 = vld [vmem:[#allocation3 + $0x8] sm:$0xff]  ;;  %v1783_v12 = vld [vmem:[%s2413_s4] ss:$0 sm:$0xff] }
  0x38   :  { %1867 = vmatprep.subr.mxu0 %v94_v4  ;;  %1879 = vmatpush3.msra.mxu1 %v187_v3  ;;  %v1780_v16 = vld [vmem:[%s2411_s2] ss:$0 sm:$0xff]  ;;  %v274_v22 = vld [vmem:[#allocation9 + $0x18] sm:$0xff]  ;;  %v273_v23 = vld [vmem:[#allocation9 + $0x10] sm:$0xff] }
  0x39   :  { %1868 = vmatpush3.msra.mxu0 %v94_v4  ;;  %1880 = vmatprep.subr.mxu1 %v186_v5  ;;  %v272_v24 = vld [vmem:[#allocation9 + $0x8] sm:$0xff]  ;;  %v271_v25 = vld [vmem:[#allocation9] sm:$0xff] }
  0x3a   :  { %1869 = vmatprep.subr.mxu0 %v93_v6  ;;  %1881 = vmatpush3.msra.mxu1 %v186_v5  ;;  %v1786_v45 = vld [vmem:[%s2415_s6] ss:$0 sm:$0xff]  ;;  %s2142_s6 = smov 112  }
  0x3b   :  { %1870 = vmatpush3.msra.mxu0 %v93_v6  ;;  %1882 = vmatprep.subr.mxu1 %v185_v7 }
  0x3c   :  { %1884 = vmatprep.mubr.msk.f32.mxu1 %vm103_vm0, %v90_v8  ;;  %1883 = vmatpush3.msra.mxu1 %v185_v7 }
  0x3d   :  { %1871 = vmatprep.subr.mxu0 %v92_v9  ;;  %1885 = vmatmul.mubr.msk.f32.vlgmr.msra.gmra.mxu1 %vm103_vm0, %v91_v10 }
  0x3e   :  { %1872 = vmatpush3.msra.mxu0 %v92_v9  ;;  %1873 = vmatprep.mubr.msk.f32.mxu0 %vm103_vm0, %v90_v8 }
  0x3f   :  { %1874 = vmatmul.mubr.msk.f32.vlgmr.msra.gmra.mxu0 %vm103_vm0, %v91_v10  ;;  %1898 = vmatprep.subr.mxu1 %v2139_v11 }
  0x40   :  { %1895 = vmatprep.mubr.msk.f32.mxu0 %vm103_vm0, %v90_v8  ;;  %1900 = vmatprep.mubr.msk.f32.mxu1 %vm2140_vm1, %v2139_v11 }
  0x41   :  { %1887 = vmatprep.subr.mxu0 %v274_v22 }
  0x42   :  { %1888 = vmatpush3.msra.mxu0 %v274_v22 }
  0x43   :  { %1889 = vmatprep.subr.mxu0 %v273_v23 }
  0x44   :  { %1890 = vmatpush3.msra.mxu0 %v273_v23 }
  0x45   :  { %1891 = vmatprep.subr.mxu0 %v272_v24 }
  0x46   :  { %1892 = vmatpush3.msra.mxu0 %v272_v24 }
  0x47   :  { %1893 = vmatprep.subr.mxu0 %v271_v25 }
  0x48   :  { %1894 = vmatpush3.msra.mxu0 %v271_v25 }
  0x49   :  { %1896 = vmatmul.mubr.msk.f32.vlgmr.msra.gmra.mxu0 %vm103_vm0, %v91_v10  ;;  %1908 = vmatprep.subr.mxu0 %v2139_v11 }
  0x4a   :  { %1910 = vmatprep.mubr.msk.f32.mxu0 %vm2140_vm1, %v2139_v11 }
  0xfd   :  { %v1886_v13 = vpop.f32.mrf.mxu1 }
  0xfe   :  { %v2234_v14 = vadd.f32 %v1886_v13, %v1783_v12 }
  0xff   :  { %v1875_v15 = vpop.f32.mrf.mxu0  ;;  %v262_v17 = vpop.f32.mrf.mxu1 }
 0x100   :  { %v2239_v18 = vadd.f32 %v1783_v12, %v262_v17  ;;  %777 = vrot.lane.b32.xlu1 %v2234_v14, %s2141_s11  ;;  %v2256_v21 = vadd.f32 %v1875_v15, %v1780_v16 }
 0x101   :  { %v176_v19 = vpop.f32.mrf.mxu0 }
 0x102   :  { %v2243_v20 = vadd.f32 %v1780_v16, %v176_v19  ;;  %1899 = vmatpush3.xpose.msk.msra.mxu1 %vm358_vm2, %v2239_v18 }
 0x103   :  { %1903 = vmatprep.subr.mxu1 %v2139_v11 }
 0x104   :  { %697 = vrot.lane.b32.xlu1 %v2243_v20, %s2141_s11 }
 0x105   :  { %1901 = vmatmul.mubr.msk.f32.vlgmr.msra.gmra.mxu1 %vm358_vm2, %v2243_v20 }
 0x106   :  { %1904 = vmatpush3.xpose.msk.msra.mxu1 %vm358_vm2, %v2234_v14  ;;  %1905 = vmatprep.mubr.msk.f32.mxu1 %vm2140_vm1, %v2139_v11 }
 0x107   :  { %1913 = vmatprep.subr.mxu1 %v2139_v11 }
 0x109   :  { %1906 = vmatmul.mubr.msk.f32.vlgmr.msra.gmra.mxu1 %vm358_vm2, %v2256_v21  ;;  %v1897_v44 = vpop.f32.mrf.mxu0 }
 0x10a   :  { %1915 = vmatprep.mubr.msk.f32.mxu1 %vm2140_vm1, %v2139_v11  ;;  %v2276_v46 = vadd.f32 %v1897_v44, %v1786_v45 }
 0x10b   :  { %v348_v47 = vpop.f32.mrf.mxu0 }
 0x10c   :  { %1914 = vmatpush3.msra.mxu1 %v2276_v46  ;;  %v2279_v48 = vadd.f32 %v1786_v45, %v348_v47 }
 0x10d   :  { %1923 = vmatprep.subr.mxu1 %v2139_v11 }
 0x10e   :  { %1909 = vmatpush3.msra.mxu0 %v2279_v48 }
 0x10f   :  { %1918 = vmatprep.subr.mxu0 %v2139_v11 }
 0x172   :  { %v778_v49 = vpop.permute.xlu1 %777 }
 0x176   :  { %v698_v50 = vpop.permute.xlu1 %697 }
 0x1c5   :  { %v431_v26 = vpop.f32.mrf.mxu1 }
 0x1c6   :  { %v511_v27 = vmul.f32 0.35355338, %v431_v26 }
 0x1c7   :  { %v1902_v28 = vpop.f32.mrf.mxu1 }
 0x1c8   :  { %v513_v29 = vsel %vm358_vm2, %v511_v27, -inf }
 0x1c9   :  { %514 = vmax.xlane.f32.xlu0 %v513_v29  ;;  %v507_v30 = vpop.f32.mrf.mxu1 }
 0x1ca   :  { %v512_v31 = vmul.f32 0.35355338, %v507_v30 }
 0x1cb   :  { %v1907_v32 = vpop.f32.mrf.mxu1 }
 0x1cc   :  { %v516_v33 = vsel %vm358_vm2, %v512_v31, -inf }
 0x1cd   :  { %517 = vmax.xlane.f32.xlu0 %v516_v33 }
 0x1e3   :  { %699 = vrot.lane.b32.xlu0 %v2239_v18, %s2141_s11 }
 0x252   :  { %v515_v34 = vpop.xlane.xlu0 %514 }
 0x253   :  { %v519_v35 = vsub.f32 %v511_v27, %v515_v34 }
 0x255   :  { %v521_v36 = vmul.f32 1.442695, %v519_v35 }
 0x256   :  { %v518_v37 = vpop.xlane.xlu0 %517 }
 0x257   :  { %1993 = vpow2.f32 %v521_v36  ;;  %v520_v38 = vsub.f32 %v512_v31, %v518_v37 }
 0x259   :  { %v523_v39 = vmul.f32 1.442695, %v520_v38 }
 0x25a   :  { %v700_v55 = vpop.permute.xlu0 %699 }
 0x25b   :  { %1995 = vpow2.f32 %v523_v39 }
 0x264   :  { %v1994_v40 = vpop.eup %1993 }
 0x265   :  { %v525_v41 = vsel %vm358_vm2, %v1994_v40, 0.0 }
 0x266   :  { %526 = vadd.xlane.f32.xlu1 %v525_v41 }
 0x268   :  { %v1996_v42 = vpop.eup %1995 }
 0x269   :  { %v528_v43 = vsel %vm358_vm2, %v1996_v42, 0.0 }
 0x26a   :  { %529 = vadd.xlane.f32.xlu1 %v528_v43 }
 0x27b   :  { %775 = vrot.lane.b32.xlu1 %v2256_v21, %s2141_s11 }
 0x2ef   :  { %v527_v51 = vpop.xlane.xlu1 %526 }
 0x2f0   :  { %1997 = vrcp.f32 %v527_v51 }
 0x2f3   :  { %v530_v52 = vpop.xlane.xlu1 %529 }
 0x2f4   :  { %1999 = vrcp.f32 %v530_v52 }
 0x2f7   :  { %v776_v58 = vpop.permute.xlu1 %775 }
 0x2fd   :  { %v1998_v53 = vpop.eup %1997 }
 0x2fe   :  { %v533_v54 = vmul.f32 %v1998_v53, %v1994_v40 }
 0x300   :  { %1911 = vmatmul.mubr.msk.f32.vlgmr.msra.gmra.mxu0 %vm358_vm2, %v533_v54 }
 0x301   :  { %v2000_v56 = vpop.eup %1999  ;;  %1919 = vmatpush3.xpose.msk.msra.mxu0 %vm358_vm2, %v700_v55  ;;  %1920 = vmatprep.mubr.msk.f32.mxu0 %vm2140_vm1, %v2139_v11 }
 0x302   :  { %v534_v57 = vmul.f32 %v2000_v56, %v1996_v42  ;;  %1928 = vmatprep.subr.mxu0 %v2139_v11 }
 0x304   :  { %1916 = vmatmul.mubr.msk.f32.vlgmr.msra.gmra.mxu1 %vm358_vm2, %v534_v57  ;;  %1921 = vmatmul.mubr.msk.f32.vlgmr.msra.gmra.mxu0 %vm358_vm2, %v698_v50 }
 0x305   :  { %1924 = vmatpush3.xpose.msk.msra.mxu1 %vm358_vm2, %v778_v49  ;;  %1925 = vmatprep.mubr.msk.f32.mxu1 %vm2140_vm1, %v2139_v11 }
 0x306   :  { %1933 = vmatprep.subr.mxu1 %v2139_v11  ;;  %1930 = vmatprep.mubr.msk.f32.mxu0 %vm2140_vm1, %v2139_v11 }
 0x308   :  { %1926 = vmatmul.mubr.msk.f32.vlgmr.msra.gmra.mxu1 %vm358_vm2, %v776_v58 }
 0x309   :  { %1935 = vmatprep.mubr.msk.f32.mxu1 %vm2140_vm1, %v2139_v11 }
 0x3c0   :  { %v2302_v59 = vpop.f32.mrf.mxu0 }
 0x3c2   :  { %v1912_v60 = vpop.f32.mrf.mxu0 }
 0x3c4   :  { %v2304_v61 = vpop.f32.mrf.mxu1  ;;  %v771_v62 = vpop.f32.mrf.mxu0 }
 0x3c5   :  { %v853_v63 = vmul.f32 0.35355338, %v771_v62 }
 0x3c6   :  { %v1917_v0 = vpop.f32.mrf.mxu1  ;;  %v1922_v1 = vpop.f32.mrf.mxu0 }
 0x3c7   :  { %v855_v2 = vsel %vm358_vm2, %v853_v63, -inf }
 0x3c8   :  { %856 = vmax.xlane.f32.xlu0 %v855_v2  ;;  %v849_v3 = vpop.f32.mrf.mxu1 }
 0x3c9   :  { %v854_v4 = vmul.f32 0.35355338, %v849_v3 }
 0x3ca   :  { %v1927_v5 = vpop.f32.mrf.mxu1 }
 0x3cb   :  { %v858_v6 = vsel %vm358_vm2, %v854_v4, -inf }
 0x3cc   :  { %859 = vmax.xlane.f32.xlu1 %v858_v6 }
 0x3dd   :  { %955 = vrot.lane.b32.xlu1 %v2276_v46, %s2141_s11 }
 0x3e1   :  { %1046 = vrot.lane.b32.xlu1 %v2239_v18, %s2142_s6 }
 0x3e5   :  { %1124 = vrot.lane.b32.xlu1 %v2234_v14, %s2142_s6 }
 0x3e9   :  { %1122 = vrot.lane.b32.xlu1 %v2256_v21, %s2142_s6 }
 0x451   :  { %v857_v7 = vpop.xlane.xlu0 %856 }
 0x452   :  { %v861_v8 = vsub.f32 %v853_v63, %v857_v7 }
 0x454   :  { %v863_v9 = vmul.f32 1.442695, %v861_v8 }
 0x455   :  { %v860_v10 = vpop.xlane.xlu1 %859 }
 0x456   :  { %2001 = vpow2.f32 %v863_v9  ;;  %v862_v12 = vsub.f32 %v854_v4, %v860_v10 }
 0x458   :  { %v865_v13 = vmul.f32 1.442695, %v862_v12 }
 0x459   :  { %v956_v15 = vpop.permute.xlu1 %955 }
 0x45a   :  { %2003 = vpow2.f32 %v865_v13  ;;  %1934 = vmatpush3.msra.mxu1 %v956_v15 }
 0x45b   :  { %1943 = vmatprep.subr.mxu1 %v2139_v11 }
 0x45d   :  { %v1047_v26 = vpop.permute.xlu1 %1046 }
 0x461   :  { %v1125_v30 = vpop.permute.xlu1 %1124 }
 0x463   :  { %v2002_v16 = vpop.eup %2001 }
 0x464   :  { %v867_v17 = vsel %vm358_vm2, %v2002_v16, 0.0 }
 0x465   :  { %868 = vadd.xlane.f32.xlu0 %v867_v17  ;;  %v1123_v33 = vpop.permute.xlu1 %1122 }
 0x467   :  { %v2004_v19 = vpop.eup %2003 }
 0x468   :  { %v870_v22 = vsel %vm358_vm2, %v2004_v19, 0.0 }
 0x469   :  { %871 = vadd.xlane.f32.xlu0 %v870_v22 }
 0x47f   :  { %878 = vrot.lane.b32.xlu0 %v2279_v48, %s2141_s11 }
 0x483   :  { %1044 = vrot.lane.b32.xlu0 %v2243_v20, %s2142_s6 }
 0x4ee   :  { %v869_v23 = vpop.xlane.xlu0 %868 }
 0x4ef   :  { %2005 = vrcp.f32 %v869_v23 }
 0x4f2   :  { %v872_v24 = vpop.xlane.xlu0 %871 }
 0x4f3   :  { %2007 = vrcp.f32 %v872_v24 }
 0x4f6   :  { %v879_v25 = vpop.permute.xlu0 %878 }
 0x4f7   :  { %1929 = vmatpush3.msra.mxu0 %v879_v25 }
 0x4f8   :  { %1938 = vmatprep.subr.mxu0 %v2139_v11 }
 0x4fa   :  { %v1045_v32 = vpop.permute.xlu0 %1044 }
 0x4fc   :  { %v2006_v27 = vpop.eup %2005 }
 0x4fd   :  { %v875_v28 = vmul.f32 %v2006_v27, %v2002_v16 }
 0x4ff   :  { %1931 = vmatmul.mubr.msk.f32.vlgmr.msra.gmra.mxu0 %vm358_vm2, %v875_v28 }
 0x500   :  { %v2008_v29 = vpop.eup %2007  ;;  %1939 = vmatpush3.xpose.msk.msra.mxu0 %vm358_vm2, %v1047_v26  ;;  %1940 = vmatprep.mubr.msk.f32.mxu0 %vm2140_vm1, %v2139_v11 }
 0x501   :  { %v876_v31 = vmul.f32 %v2008_v29, %v2004_v19  ;;  %1948 = vmatprep.subr.mxu0 %v2139_v11 }
 0x503   :  { %1936 = vmatmul.mubr.msk.f32.vlgmr.msra.gmra.mxu1 %vm358_vm2, %v876_v31  ;;  %1941 = vmatmul.mubr.msk.f32.vlgmr.msra.gmra.mxu0 %vm358_vm2, %v1045_v32 }
 0x504   :  { %1944 = vmatpush3.xpose.msk.msra.mxu1 %vm358_vm2, %v1125_v30  ;;  %1945 = vmatprep.mubr.msk.f32.mxu1 %vm2140_vm1, %v2139_v11 }
 0x505   :  { %1953 = vmatprep.subr.mxu1 %v2139_v11  ;;  %1950 = vmatprep.mubr.msk.f32.mxu0 %vm2140_vm1, %v2139_v11 }
 0x507   :  { %1946 = vmatmul.mubr.msk.f32.vlgmr.msra.gmra.mxu1 %vm358_vm2, %v1123_v33 }
 0x508   :  { %1955 = vmatprep.mubr.msk.f32.mxu1 %vm2140_vm1, %v2139_v11 }
 0x5bf   :  { %v2340_v34 = vpop.f32.mrf.mxu0 }
 0x5c1   :  { %v1932_v35 = vpop.f32.mrf.mxu0 }
 0x5c3   :  { %v2342_v36 = vpop.f32.mrf.mxu1  ;;  %v1118_v37 = vpop.f32.mrf.mxu0 }
 0x5c4   :  { %v1200_v38 = vmul.f32 0.35355338, %v1118_v37 }
 0x5c5   :  { %v1937_v39 = vpop.f32.mrf.mxu1  ;;  %v1942_v40 = vpop.f32.mrf.mxu0 }
 0x5c6   :  { %v1202_v41 = vsel %vm358_vm2, %v1200_v38, -inf }
 0x5c7   :  { %1203 = vmax.xlane.f32.xlu0 %v1202_v41  ;;  %v1196_v42 = vpop.f32.mrf.mxu1 }
 0x5c8   :  { %v1201_v43 = vmul.f32 0.35355338, %v1196_v42 }
 0x5c9   :  { %v1947_v44 = vpop.f32.mrf.mxu1 }
 0x5ca   :  { %v1205_v45 = vsel %vm358_vm2, %v1201_v43, -inf }
 0x5cb   :  { %1206 = vmax.xlane.f32.xlu1 %v1205_v45 }
 0x5dc   :  { %1300 = vrot.lane.b32.xlu1 %v2276_v46, %s2142_s6 }
 0x5e0   :  { %1391 = vrot.lane.b32.xlu1 %v2239_v18, %s2143_s12 }
 0x5e4   :  { %1469 = vrot.lane.b32.xlu1 %v2234_v14, %s2143_s12 }
 0x5e8   :  { %1467 = vrot.lane.b32.xlu1 %v2256_v21, %s2143_s12 }
 0x650   :  { %v1204_v47 = vpop.xlane.xlu0 %1203 }
 0x651   :  { %v1208_v49 = vsub.f32 %v1200_v38, %v1204_v47 }
 0x653   :  { %v1210_v50 = vmul.f32 1.442695, %v1208_v49 }
 0x654   :  { %v1207_v51 = vpop.xlane.xlu1 %1206 }
 0x655   :  { %2009 = vpow2.f32 %v1210_v50  ;;  %v1209_v52 = vsub.f32 %v1201_v43, %v1207_v51  ;;  %v2144_v51 = vmov 0  }
 0x656   :  { %1991 = vset.pattern.permute.xlu1 %v2144_v51  ;;  %1992 = vset.pattern.permute.xlu0 %v2144_v51 }
 0x657   :  { %v1212_v53 = vmul.f32 1.442695, %v1209_v52 }
 0x658   :  { %v1301_v54 = vpop.permute.xlu1 %1300 }
 0x659   :  { %2011 = vpow2.f32 %v1212_v53  ;;  %1954 = vmatpush3.msra.mxu1 %v1301_v54 }
 0x65a   :  { %1963 = vmatprep.subr.mxu1 %v2139_v11 }
 0x65c   :  { %v1392_v60 = vpop.permute.xlu1 %1391 }
 0x660   :  { %v1470_v1 = vpop.permute.xlu1 %1469 }
 0x662   :  { %v2010_v55 = vpop.eup %2009 }
 0x663   :  { %v1214_v18 = vsel %vm358_vm2, %v2010_v55, 0.0 }
 0x664   :  { %1215 = vadd.xlane.f32.xlu0 %v1214_v18  ;;  %v1468_v3 = vpop.permute.xlu1 %1467 }
 0x666   :  { %v2012_v14 = vpop.eup %2011 }
 0x667   :  { %v1217_v56 = vsel %vm358_vm2, %v2012_v14, 0.0 }
 0x668   :  { %1218 = vadd.xlane.f32.xlu0 %v1217_v56 }
 0x67e   :  { %1224 = vrot.lane.b32.xlu0 %v2279_v48, %s2142_s6 }
 0x682   :  { %1389 = vrot.lane.b32.xlu0 %v2243_v20, %s2143_s12 }
 0x6ed   :  { %v1216_v21 = vpop.xlane.xlu0 %1215 }
 0x6ee   :  { %2013 = vrcp.f32 %v1216_v21 }
 0x6f1   :  { %v1219_v57 = vpop.xlane.xlu0 %1218 }
 0x6f2   :  { %2015 = vrcp.f32 %v1219_v57 }
 0x6f5   :  { %v1225_v58 = vpop.permute.xlu0 %1224 }
 0x6f6   :  { %1949 = vmatpush3.msra.mxu0 %v1225_v58  ;;  %v1814_v58 = vld [vmem:[#allocation2] ss:$0 sm:$0xff] }
 0x6f7   :  { %1958 = vmatprep.subr.mxu0 %v2139_v11 }
 0x6f9   :  { %v1390_v2 = vpop.permute.xlu0 %1389 }
 0x6fb   :  { %v2014_v62 = vpop.eup %2013 }
 0x6fc   :  { %v1222_v63 = vmul.f32 %v2014_v62, %v2010_v55 }
 0x6fe   :  { %1951 = vmatmul.mubr.msk.f32.vlgmr.msra.gmra.mxu0 %vm358_vm2, %v1222_v63 }
 0x6ff   :  { %v2016_v0 = vpop.eup %2015  ;;  %1959 = vmatpush3.xpose.msk.msra.mxu0 %vm358_vm2, %v1392_v60  ;;  %1960 = vmatprep.mubr.msk.f32.mxu0 %vm2140_vm1, %v2139_v11 }
 0x700   :  { %v1223_v20 = vmul.f32 %v2016_v0, %v2012_v14  ;;  %1968 = vmatprep.subr.mxu0 %v2139_v11 }
 0x702   :  { %1956 = vmatmul.mubr.msk.f32.vlgmr.msra.gmra.mxu1 %vm358_vm2, %v1223_v20  ;;  %1961 = vmatmul.mubr.msk.f32.vlgmr.msra.gmra.mxu0 %vm358_vm2, %v1390_v2  ;;  %v1748_v2 = vlaneseq }
 0x703   :  { %1964 = vmatpush3.xpose.msk.msra.mxu1 %vm358_vm2, %v1470_v1  ;;  %1965 = vmatprep.mubr.msk.f32.mxu1 %vm2140_vm1, %v2139_v11 }
 0x704   :  { %1973 = vmatprep.subr.mxu1 %v2139_v11  ;;  %1970 = vmatprep.mubr.msk.f32.mxu0 %vm2140_vm1, %v2139_v11 }
 0x706   :  { %1966 = vmatmul.mubr.msk.f32.vlgmr.msra.gmra.mxu1 %vm358_vm2, %v1468_v3 }
 0x707   :  { %1975 = vmatprep.mubr.msk.f32.mxu1 %vm2140_vm1, %v2139_v11  ;;  %v1795_v11 = vld [vmem:[%s2416_s7] ss:$0 sm:$0xff]  ;;  %s2145_s7 = smov [#allocation11]  }
 0x708   :  { %v687_v19 = vmul.f32 %v1795_v11, %v2302_v59  ;;  %v688_v38 = vmul.f32 %v1795_v11, %v2304_v61  ;;  %s1769_s15 = sshll.u32 %s2145_s7, 4  ;;  %s1770_s15 = int_to_ptr.vmem [resolvable:$true] %s1769_s15 }
 0x709   :  { %s2105_s16 = scalar_lea.vmem %s1770_s15, 32  ;;  %p2110_p7 = scmp.lt.s32.totalorder %s1770_s15, %s1770_s15 }
 0x70a   :  { %v689_v22 = vsel %vm358_vm2, %v687_v19, 0.0  ;;  %v692_v40 = vsel %vm358_vm2, %v688_v38, 0.0  ;;  %p2106_p6 = scmp.ne.s32.totalorder %s1770_s15, %s2105_s16  ;;  %p2111_p8 = scmp.lt.s32.totalorder %s2105_s16, %s2105_s16 }
 0x70c   :  { %p2112_p9 = por %p2111_p8, %p2110_p7 }
 0x70e   :  { %p2113_p10 = pnand %p2112_p9, %p2106_p6 }
 0x7be   :  { %v1296_v4 = vpop.f32.mrf.mxu0 }
 0x7c0   :  { %v1952_v5 = vpop.f32.mrf.mxu0 }
 0x7c2   :  { %v1372_v6 = vpop.f32.mrf.mxu1  ;;  %v1463_v7 = vpop.f32.mrf.mxu0 }
 0x7c3   :  { %v1545_v8 = vmul.f32 0.35355338, %v1463_v7  ;;  %v1749_v7 = vand.u32 127, %v1748_v2 }
 0x7c4   :  { %v1957_v9 = vpop.f32.mrf.mxu1  ;;  %v1962_v10 = vpop.f32.mrf.mxu0 }
 0x7c5   :  { %v1547_v12 = vsel %vm358_vm2, %v1545_v8, -inf }
 0x7c6   :  { %1548 = vmax.xlane.f32.xlu0 %v1547_v12  ;;  %v1541_v13 = vpop.f32.mrf.mxu1 }
 0x7c7   :  { %v1546_v15 = vmul.f32 0.35355338, %v1541_v13 }
 0x7c8   :  { %v1967_v16 = vpop.f32.mrf.mxu1 }
 0x7c9   :  { %v1550_v17 = vsel %vm358_vm2, %v1546_v15, -inf }
 0x7ca   :  { %1551 = vmax.xlane.f32.xlu1 %v1550_v17 }
 0x7db   :  { %1645 = vrot.lane.b32.xlu1 %v2276_v46, %s2143_s12 }
 0x7df   :  { %1031 = vrot.lane.b32.xlu1 %v1795_v11, %s2141_s11 }
 0x7e3   :  { %1376 = vrot.lane.b32.xlu1 %v1795_v11, %s2142_s6 }
 0x807   :  { %690 = vadd.xlane.f32.xlu1 %v689_v22 }
 0x84f   :  { %v1549_v23 = vpop.xlane.xlu0 %1548 }
 0x850   :  { %v1553_v24 = vsub.f32 %v1545_v8, %v1549_v23  ;;  %v1751_v8 = vshrl.u32 %v1748_v2, 7 }
 0x852   :  { %v1555_v25 = vmul.f32 1.442695, %v1553_v24 }
 0x853   :  { %v1552_v26 = vpop.xlane.xlu1 %1551 }
 0x854   :  { %2017 = vpow2.f32 %v1555_v25  ;;  %v1554_v27 = vsub.f32 %v1546_v15, %v1552_v26  ;;  %v1752_v15 = vsub.s32 %v1749_v7, %v1751_v8 }
 0x856   :  { %v1557_v46 = vmul.f32 1.442695, %v1554_v27 }
 0x857   :  { %v1646_v28 = vpop.permute.xlu1 %1645 }
 0x858   :  { %2019 = vpow2.f32 %v1557_v46  ;;  %1974 = vmatpush3.msra.mxu1 %v1646_v28 }
 0x85b   :  { %v1032_v29 = vpop.permute.xlu1 %1031 }
 0x85c   :  { %v1034_v39 = vmul.f32 %v1032_v29, %v2340_v34  ;;  %v1035_v41 = vmul.f32 %v1032_v29, %v2342_v36 }
 0x85e   :  { %v1036_v42 = vsel %vm358_vm2, %v1034_v39, 0.0  ;;  %v1039_v44 = vsel %vm358_vm2, %v1035_v41, 0.0 }
 0x85f   :  { %v1377_v30 = vpop.permute.xlu1 %1376 }
 0x860   :  { %v1379_v31 = vmul.f32 %v1377_v30, %v1296_v4  ;;  %v1380_v43 = vmul.f32 %v1377_v30, %v1372_v6 }
 0x861   :  { %v2018_v32 = vpop.eup %2017 }
 0x862   :  { %v1559_v33 = vsel %vm358_vm2, %v2018_v32, 0.0  ;;  %v1381_v59 = vsel %vm358_vm2, %v1379_v31, 0.0 }
 0x863   :  { %1560 = vadd.xlane.f32.xlu0 %v1559_v33  ;;  %1382 = vadd.xlane.f32.xlu1 %v1381_v59 }
 0x865   :  { %v2020_v35 = vpop.eup %2019 }
 0x866   :  { %v1562_v37 = vsel %vm358_vm2, %v2020_v35, 0.0 }
 0x867   :  { %1563 = vadd.xlane.f32.xlu0 %v1562_v37 }
 0x87d   :  { %1569 = vrot.lane.b32.xlu0 %v2279_v48, %s2143_s12  ;;  %v1384_v48 = vsel %vm358_vm2, %v1380_v43, 0.0 }
 0x881   :  { %1721 = vrot.lane.b32.xlu0 %v1795_v11, %s2143_s12 }
 0x890   :  { %v691_v63 = vpop.xlane.xlu1 %690 }
 0x8a0   :  { %693 = vadd.xlane.f32.xlu0 %v692_v40 }
 0x8a4   :  { %1037 = vadd.xlane.f32.xlu0 %v1036_v42 }
 0x8a8   :  { %1040 = vadd.xlane.f32.xlu0 %v1039_v44 }
 0x8ac   :  { %1385 = vadd.xlane.f32.xlu0 %v1384_v48 }
 0x8ec   :  { %v1561_v45 = vpop.xlane.xlu0 %1560  ;;  %v1383_v1 = vpop.xlane.xlu1 %1382 }
 0x8ed   :  { %2021 = vrcp.f32 %v1561_v45 }
 0x8f0   :  { %v1564_v61 = vpop.xlane.xlu0 %1563 }
 0x8f1   :  { %2023 = vrcp.f32 %v1564_v61 }
 0x8f4   :  { %v1570_v34 = vpop.permute.xlu0 %1569 }
 0x8f5   :  { %1969 = vmatpush3.msra.mxu0 %v1570_v34 }
 0x8f8   :  { %v1722_v52 = vpop.permute.xlu0 %1721 }
 0x8fa   :  { %v2022_v47 = vpop.eup %2021 }
 0x8fb   :  { %v1567_v49 = vmul.f32 %v2022_v47, %v2018_v32 }
 0x8fd   :  { %1971 = vmatmul.mubr.msk.f32.vlgmr.msra.gmra.mxu0 %vm358_vm2, %v1567_v49 }
 0x8fe   :  { %v2024_v36 = vpop.eup %2023 }
 0x8ff   :  { %v1568_v50 = vmul.f32 %v2024_v36, %v2020_v35 }
 0x901   :  { %1976 = vmatmul.mubr.msk.f32.vlgmr.msra.gmra.mxu1 %vm358_vm2, %v1568_v50 }
 0x929   :  { %v694_v60 = vpop.xlane.xlu0 %693 }
 0x92d   :  { %v1038_v62 = vpop.xlane.xlu0 %1037 }
 0x92e   :  { %v1042_v20 = vadd.f32 %v1038_v62, %v691_v63 }
 0x930   :  { %v1387_v6 = vadd.f32 %v1383_v1, %v1042_v20 }
 0x931   :  { %v1041_v0 = vpop.xlane.xlu0 %1040 }
 0x932   :  { %v1043_v5 = vadd.f32 %v1041_v0, %v694_v60 }
 0x935   :  { %v1386_v3 = vpop.xlane.xlu0 %1385 }
 0x936   :  { %v1388_v9 = vadd.f32 %v1386_v3, %v1043_v5 }
 0x9bd   :  { %v1641_v53 = vpop.f32.mrf.mxu0 }
 0x9be   :  { %v1724_v54 = vmul.f32 %v1722_v52, %v1641_v53 }
 0x9bf   :  { %v1972_v55 = vpop.f32.mrf.mxu0 }
 0x9c0   :  { %v1726_v18 = vsel %vm358_vm2, %v1724_v54, 0.0 }
 0x9c1   :  { %1727 = vadd.xlane.f32.xlu1 %v1726_v18  ;;  %v1717_v14 = vpop.f32.mrf.mxu1 }
 0x9c2   :  { %v1725_v56 = vmul.f32 %v1722_v52, %v1717_v14 }
 0x9c3   :  { %v1977_v21 = vpop.f32.mrf.mxu1 }
 0x9c4   :  { %v1729_v57 = vsel %vm358_vm2, %v1725_v56, 0.0 }
 0x9c5   :  { %1730 = vadd.xlane.f32.xlu0 %v1729_v57 }
 0x9d2   :  { %1741 = vperm.xlu1 %1991, %v1814_v58  }
 0xa4a   :  { %v1728_v4 = vpop.xlane.xlu1 %1727 }
 0xa4b   :  { %v1732_v10 = vadd.f32 %v1728_v4, %v1387_v6 }
 0xa4e   :  { %v1742_v12 = vpop.permute.xlu1 %1741  ;;  %v1731_v13 = vpop.xlane.xlu0 %1730 }
 0xa4f   :  { %v1744_v16 = vadd.f32 %v1742_v12, %v1732_v10  ;;  %v1733_v17 = vadd.f32 %v1731_v13, %v1388_v9 }
 0xa51   :  { %v1745_v11 = vadd.f32 %v1742_v12, %v1733_v17  ;;  %v1753_v19 = vrot.slane %v1744_v16, %v1752_v15 }
 0xa53   :  { %v1757_v22 = vrot.slane %v1745_v11, %v1752_v15 }
 0xa55   :  { %v1759_v23 = vsel %vm1758_vm3, %v1757_v22, %v1753_v19 }
 0xa56   :  { %1762 = vst.msk [vmem:[#allocation11] sm:$0x3] %vm1761_vm4, %v1759_v23 }
 0xa57   :  { %2116 = shalt.err (!%p2113_p10)
}
 0xa58   :  { %1772 = dma.vmem_to_hbm [thread:$0]  %s1770_s15, 32, %s2418_s9, [#allocation5]  }
 0xa59   :  { %2131 = dma.done.wait [#allocation5], 32  }
 0xa5a   :  { %2132 = vsyncadd [#allocation5], 4294967264 }
 0xa5b   :  { %1776 = vsyncpa [#allocation4], 1 }
 0xa5c   :  { %1777 = vsyncpa [#allocation7], 1 }
 0xa5d   :  { %1778 = vsyncpa [#allocation10], 1 }
 0xa5e   :  { %1779 = vsyncpa [#allocation5], 1 }

</bundles_post_ra>
